<compile_context>
chip_gen: v7x
topology: tpu7x:2x2x1
jax: 0.10.0
libtpu: 0.0.40
codegen_flags: <defaults>
</compile_context>

<pallas_src>
import math
import jax
import jax.numpy as jnp
from jax.experimental import pallas as pl
from jax.experimental.pallas import tpu as pltpu


def torgb_kernel(wmod_ref, x_ref, b_ref, o_ref):
    # wmod_ref: (C_out, C_in)   per-sample modulated 1x1 weight, f32
    # x_ref:    (C_in, TILE_HW) current spatial tile of the current sample (native dtype)
    # b_ref:    (C_out, 1)      output bias, f32
    # o_ref:    (C_out, TILE_HW)
    x = x_ref[...].astype(jnp.float32)                 # free-ish VPU cast; no extra HBM pass
    y = jnp.dot(wmod_ref[...], x, preferred_element_type=jnp.float32)
    o_ref[...] = (y + b_ref[...]).astype(o_ref.dtype)


def _choose_tile_hw(c_in, c_out, hw, x_bytes, out_bytes):
    """Spatial tile (multiple of 128): big enough to amortize per-step overhead,
    small enough that the double-buffered working set stays a few MiB and each
    sample gets several grid steps (DMA overlap + dual-TC sharding on v7x)."""
    hw128 = pl.cdiv(hw, 128) * 128
    # Double-buffered x column + out column bytes per lane.
    per_lane = 2 * (c_in * x_bytes + c_out * out_bytes)
    budget_tile = max(128, ((8 << 20) // per_lane) // 128 * 128)    # ~8 MiB working set cap
    steps_tile = max(512, (hw128 // 8) // 128 * 128)                # >= ~8 steps for big maps
    cap = min(budget_tile, steps_tile)
    if hw % 128 == 0:
        # Snap to the largest 128*2^k divisor of HW that fits the cap -> no
        # partial last block for the (power-of-two) StyleGAN feature maps.
        tile = 128
        while tile * 2 <= cap and hw % (tile * 2) == 0:
            tile *= 2
        return int(tile)
    return int(min(cap, hw128))


def torgb_forward(x, w_latent, params, *, tile_hw=None):
    """x: (N, C_in, H, W), w_latent: (N, latent). Returns (N, C_out, H, W) in x.dtype."""
    N, C_in, H, W = x.shape
    latent = w_latent.shape[1]
    weight = params["weight"]          # (C_out, C_in, 1, 1)
    bias = params["bias"]              # (C_out,)
    A_w = params["affine_weight"]      # (C_in, latent)
    A_b = params["affine_bias"]        # (C_in,)
    C_out = weight.shape[0]
    HW = H * W
    out_dtype = x.dtype

    # Equalized-lr affine producing per-sample styles (tiny, leave to XLA).
    a_gain = 1.0 / math.sqrt(latent)
    style = (w_latent.astype(jnp.float32) @ (A_w.T * a_gain) + A_b).astype(jnp.float32)  # (N, C_in)

    # Equalized-lr gain for the 1x1 conv weight (demodulate=False -> no demod).
    w_gain = 1.0 / math.sqrt(C_in * 1 * 1)
    w2d = (weight.reshape(C_out, C_in) * w_gain).astype(jnp.float32)    # (C_out, C_in)
    # Pre-modulate per sample: tiny (N, C_out, C_in) f32 tensor (keeps style
    # precision; no per-HW-tile re-modulation inside the kernel).
    w_mod = w2d[None, :, :] * style[:, None, :]                          # (N, C_out, C_in)
    b2d = bias.reshape(C_out, 1).astype(jnp.float32)

    if HW < 128:
        # Tiny feature maps (<1 vreg of lanes): masked partial stores + per-step
        # overhead make a Pallas launch a loss vs plain XLA.
        y = jnp.einsum("noi,nihw->nohw", w_mod, x.astype(jnp.float32))
        return (y + bias[None, :, None, None]).astype(out_dtype)

    x_bytes = jnp.dtype(x.dtype).itemsize
    out_bytes = jnp.dtype(out_dtype).itemsize
    if tile_hw is not None:
        assert tile_hw % 128 == 0, "tile_hw must be a multiple of 128"
        TILE_HW = int(tile_hw)
    else:
        TILE_HW = _choose_tile_hw(C_in, C_out, HW, x_bytes, out_bytes)

    # No pad / no astype: x goes to the kernel in its native dtype and shape.
    x3 = x.reshape(N, C_in, HW)
    n_hw = pl.cdiv(HW, TILE_HW)   # ragged last tile handled by Pallas boundary masking

    out = pl.pallas_call(
        torgb_kernel,
        out_shape=jax.ShapeDtypeStruct((N, C_out, HW), out_dtype),
        grid_spec=pltpu.PrefetchScalarGridSpec(
            num_scalar_prefetch=0,
            grid=(N, n_hw),
            in_specs=[
                # per-sample modulated weight (batch dim squeezed away), f32
                pl.BlockSpec((pl.Squeezed(), C_out, C_in), lambda n, t: (n, 0, 0)),
                # per-sample, per-tile activation slab (lane dim = TILE_HW)
                pl.BlockSpec((pl.Squeezed(), C_in, TILE_HW), lambda n, t: (n, 0, t)),
                # bias, resident
                pl.BlockSpec((C_out, 1), lambda n, t: (0, 0)),
            ],
            out_specs=pl.BlockSpec((pl.Squeezed(), C_out, TILE_HW),
                                   lambda n, t: (n, 0, t)),
        ),
        compiler_params=pltpu.CompilerParams(
            dimension_semantics=("parallel", "parallel"),
        ),
        # TODO(synk): on v7x, pipeline_mode=pl.Buffered(3) on the x/out specs may
        # hide DMA issue jitter further; left at the default 2-deep pipeline here.
    )(w_mod, x3, b2d)

    return out.reshape(N, C_out, H, W)


def init_params(key, conv_size, latent_size, in_channels):
    k_w, k_a = jax.random.split(key, 2)
    return {
        # Conv2dModulated weight: (out, in, k, k) with k=1
        "weight": jax.random.normal(k_w, (conv_size, in_channels, 1, 1), jnp.float32),
        # Bias(conv_size): zero-init
        "bias": jnp.zeros((conv_size,), jnp.float32),
        # affine (EqualizedLinear latent -> in_channels), bias init 1
        "affine_weight": jax.random.normal(k_a, (in_channels, latent_size), jnp.float32),
        "affine_bias": jnp.ones((in_channels,), jnp.float32),
    }


def torgb_reference(x, w_latent, params):
    N, C_in, H, W = x.shape
    latent = w_latent.shape[1]
    C_out = params["weight"].shape[0]
    a_gain = 1.0 / math.sqrt(latent)
    style = w_latent.astype(jnp.float32) @ (params["affine_weight"].T * a_gain) + params["affine_bias"]
    w_gain = 1.0 / math.sqrt(C_in)
    w2d = params["weight"].reshape(C_out, C_in) * w_gain
    y = jnp.einsum("oi,ni,nihw->nohw", w2d, style, x.astype(jnp.float32))
    return y + params["bias"][None, :, None, None]


if __name__ == "__main__":
    N, C_in, C_out, latent = 2, 16, 8, 32

    key = jax.random.PRNGKey(0)
    k_p, k_x, k_w, k_x2 = jax.random.split(key, 4)
    params = init_params(k_p, conv_size=C_out, latent_size=latent, in_channels=C_in)
    w_latent = jax.random.normal(k_w, (N, latent), jnp.float32)

    # Main test: 16x16 feature map (HW=256), auto-chosen tile (divisor of HW, no pad).
    x = jax.random.normal(k_x, (N, C_in, 16, 16), jnp.float32)
    y = torgb_forward(x, w_latent, params)
    jax.block_until_ready(y)
    y_ref = torgb_reference(x, w_latent, params)
    assert y.shape == (N, C_out, 16, 16)
    assert jnp.allclose(y, y_ref, atol=1e-4, rtol=1e-4), "mismatch vs reference (auto tile)"

    # Exercise the multi-tile spatial grid (2 HW tiles of 128 lanes).
    y_t = torgb_forward(x, w_latent, params, tile_hw=128)
    jax.block_until_ready(y_t)
    assert jnp.allclose(y_t, y_ref, atol=1e-4, rtol=1e-4), "mismatch vs reference (tiled)"

    # Ragged HW (12x12 -> 144) with tile 128: partial last block handled by
    # Pallas boundary masking — no wrapper-side pad or post-slice.
    x_rag = jax.random.normal(k_x2, (N, C_in, 12, 12), jnp.float32)
    y_r = torgb_forward(x_rag, w_latent, params, tile_hw=128)
    jax.block_until_ready(y_r)
    y_r_ref = torgb_reference(x_rag, w_latent, params)
    assert jnp.allclose(y_r, y_r_ref, atol=1e-4, rtol=1e-4), "mismatch vs reference (ragged)"

    # bf16 activations supplied by the caller: kernel reads bf16 directly
    # (half the dominant HBM read), w_mod stays f32, f32 accumulation.
    x_bf = x.astype(jnp.bfloat16)
    y_bf = torgb_forward(x_bf, w_latent, params)
    jax.block_until_ready(y_bf)
    y_bf_ref = torgb_reference(x_bf, w_latent, params).astype(jnp.bfloat16)
    assert y_bf.dtype == jnp.bfloat16
    assert jnp.allclose(y_bf.astype(jnp.float32), y_bf_ref.astype(jnp.float32),
                        atol=5e-2, rtol=5e-2), "mismatch vs reference (bf16 input)"

    # Tiny-HW layers dispatch to plain XLA.
    x_tiny = x[:, :, :8, :8]
    y_tiny = torgb_forward(x_tiny, w_latent, params)
    jax.block_until_ready(y_tiny)
    assert jnp.allclose(y_tiny, torgb_reference(x_tiny, w_latent, params),
                        atol=1e-4, rtol=1e-4), "mismatch vs reference (tiny fallback)"

    print("KERNEL_OK")
</pallas_src>

<mosaic_0001>
module attributes {stable_mosaic.version = 11 : i64} {
  func.func @torgb_kernel(%arg0: i32, %arg1: i32, %arg2: memref<1x8x16xf32, #tpu.memory_space<vmem>>, %arg3: memref<1x16x256xf32, #tpu.memory_space<vmem>>, %arg4: memref<8x1xf32, #tpu.memory_space<vmem>>, %arg5: memref<1x8x256xf32, #tpu.memory_space<vmem>>) attributes {dimension_semantics = [#tpu.dimension_semantics<parallel>, #tpu.dimension_semantics<parallel>], iteration_bounds = array<i64: 2, 1>, scalar_prefetch = 0 : i64, scratch_operands = 0 : i64, tpu.core_type = #tpu.core_type<tc>, window_params = [{transform_indices = @transform_0, window_bounds = array<i64: 1, 8, 16>}, {transform_indices = @transform_1, window_bounds = array<i64: 1, 16, 256>}, {pipeline_mode = #tpu.pipeline_mode<synchronous>, transform_indices = @transform_2, window_bounds = array<i64: 8, 1>}, {transform_indices = @transform_3, window_bounds = array<i64: 1, 8, 256>}]} {
    %c0 = arith.constant 0 : index
    %c0_0 = arith.constant 0 : index
    %c0_1 = arith.constant 0 : index
    %0 = vector.load %arg3[%c0, %c0_0, %c0_1] : memref<1x16x256xf32, #tpu.memory_space<vmem>>, vector<1x16x256xf32>
    %1 = vector.shape_cast %0 : vector<1x16x256xf32> to vector<16x256xf32>
    %c0_2 = arith.constant 0 : index
    %c0_3 = arith.constant 0 : index
    %c0_4 = arith.constant 0 : index
    %2 = vector.load %arg2[%c0_2, %c0_3, %c0_4] : memref<1x8x16xf32, #tpu.memory_space<vmem>>, vector<1x8x16xf32>
    %3 = vector.shape_cast %2 : vector<1x8x16xf32> to vector<8x16xf32>
    %cst = arith.constant dense<0.000000e+00> : vector<8x256xf32>
    %4 = tpu.matmul %3, %1, %cst {dimension_numbers = #tpu.dot_dimension_numbers<[1], [0], [0], [1], [0, 0, 1, 1], [], []>} : vector<8x16xf32>, vector<16x256xf32>, vector<8x256xf32> -> vector<8x256xf32>
    %c0_5 = arith.constant 0 : index
    %c0_6 = arith.constant 0 : index
    %5 = vector.load %arg4[%c0_5, %c0_6] : memref<8x1xf32, #tpu.memory_space<vmem>>, vector<8x1xf32>
    %6 = vector.broadcast %5 : vector<8x1xf32> to vector<8x256xf32>
    %7 = arith.addf %4, %6 : vector<8x256xf32>
    %c0_7 = arith.constant 0 : index
    %c0_8 = arith.constant 0 : index
    %c0_9 = arith.constant 0 : index
    %8 = vector.load %arg5[%c0_7, %c0_8, %c0_9] : memref<1x8x256xf32, #tpu.memory_space<vmem>>, vector<1x8x256xf32>
    %9 = vector.shape_cast %8 : vector<1x8x256xf32> to vector<8x256xf32>
    %10 = vector.shape_cast %7 : vector<8x256xf32> to vector<1x8x256xf32>
    tpu.vector_store %arg5[%c0_7, %c0_8, %c0_9], %10 {strides = array<i32>} : memref<1x8x256xf32, #tpu.memory_space<vmem>>, vector<1x8x256xf32>,
    return
  }
  func.func @transform_0(%arg0: i32, %arg1: i32) -> (i32, i32, i32) {
    %c0_i32 = arith.constant 0 : i32
    %c0_i32_0 = arith.constant 0 : i32
    %c0_i32_1 = arith.constant 0 : i32
    return %arg0, %c0_i32, %c0_i32_0 : i32, i32, i32
  }
  func.func @transform_1(%arg0: i32, %arg1: i32) -> (i32, i32, i32) {
    %c0_i32 = arith.constant 0 : i32
    %c0_i32_0 = arith.constant 0 : i32
    return %arg0, %c0_i32, %arg1 : i32, i32, i32
  }
  func.func @transform_2(%arg0: i32, %arg1: i32) -> (i32, i32) {
    %c0_i32 = arith.constant 0 : i32
    %c0_i32_0 = arith.constant 0 : i32
    %c0_i32_1 = arith.constant 0 : i32
    return %c0_i32, %c0_i32_0 : i32, i32
  }
  func.func @transform_3(%arg0: i32, %arg1: i32) -> (i32, i32, i32) {
    %c0_i32 = arith.constant 0 : i32
    %c0_i32_0 = arith.constant 0 : i32
    return %arg0, %c0_i32, %arg1 : i32, i32, i32
  }
}

</mosaic_0001>

<bundles_post_ra>
// kernel: tpu_custom_call.1
= control target key start
LH: loop header
LB: loop body
LE: loop exit
PB: predicated region body
PF: predicated region fallthrough
CT: control target
= control target key end

     0   :  { %8 = vsyncpa [#allocation3], 0  ;;  %s957_s0 = inlined_call_operand.hbm [shape: f32[2,8,16], index: 0, kind: input, shape index: {}]   ;;  %s958_s1 = inlined_call_operand.hbm [shape: f32[2,16,256], index: 1, kind: input, shape index: {}]   ;;  %s959_s2 = inlined_call_operand.vmem [shape: f32[8,1], index: 2, kind: input, shape index: {}]   ;;  %s960_s3 = inlined_call_operand.hbm [shape: f32[2,8,256], index: 3, kind: output, shape index: {}]  }
   0x1   :  { %10 = vsyncpa [#allocation3 + $0x1], 0 }
   0x2   :  { %11 = vsyncpa [#allocation6], 0 }
   0x3   :  { %13 = vsyncpa [#allocation6 + $0x1], 0 }
   0x4   :  { %14 = vsyncpa [#allocation4], 0 }
   0x5   :  { %16 = vsyncpa [#allocation4 + $0x1], 0  ;;  %s730_s12 = smov 0   ;;  %s732_s13 = smov 0  }
   0x6   :  { %s734_s14 = smov 0   ;;  %s736_s15 = smov 0  }
   0x7   :  { %s738_s16 = smov 0   ;;  %s740_s17 = smov 0  }
   0x8 LB: > { %s458_s18 = sadd.s32 4294967295, %s701_s17   ;;  %s459_s19 = sadd.s32 4294967294, %s701_s17   ;;  %s701_s17 = sphi %s740_s17, %s22_s17   ;;  %s697_s16 = sphi %s738_s16, %s979_s16   ;;  %s693_s15 = sphi %s736_s15, %s978_s15   ;;  %s689_s14 = sphi %s734_s14, %s977_s14   ;;  %s685_s13 = sphi %s732_s13, %s976_s13   ;;  %s681_s12 = sphi %s730_s12, %s975_s12  }
   0x9   : > { %s34_s20 = sadd.s32 1, %s697_s16  ;;  %s41_s21 = sadd.s32 1, %s689_s14 }
   0xa   : > { %p36_p0 = scmp.ge.s32.totalorder %s34_s20, 2  ;;  %p48_p1 = scmp.ne.s32.totalorder %s689_s14, %s685_s13 }
   0xb   : > { %p49_p2 = scmp.eq.s32.totalorder %s701_s17, 0  ;;  %p54_p3 = scmp.ne.s32.totalorder %s685_s13, %s681_s12 }
   0xc   : > { %s981_s20 = smov (%p36_p0, %s34_s20), 0  ;;  %p55_p5 = scmp.eq.s32.totalorder %s458_s18, 0 }
   0xd   : > { %p771_p4 = por %p49_p2, %p48_p1  ;;  %s38_s23 = ssub.s32 %s697_s16, %s981_s20 }
   0xe   : > { %p129_p6 = scmp.eq.s32.totalorder %s458_s18, 1  ;;  %p39_p7 = scmp.eq.s32.totalorder %s38_s23, 0 }
   0xf   : > { %p777_p8 = por %p55_p5, %p54_p3  ;;  %p135_p10 = scmp.eq.s32.totalorder %s459_s19, 1 }
  0x10   : > { %p781_p9 = por %p129_p6, %p48_p1  ;;  %p500_p13 = scmp.lt.s32.totalorder %s701_s17, 2 }
  0x11   : > { %s964_s24 = scalar_select %p777_p8, 1, 0 }
  0x12   : > { %s965_s25 = scalar_select %p781_p9, 1, 0 }
  0x13   : > { %s786_s26 = scalar_select %p39_p7, %s689_s14, %s41_s21  }
  0x14   : > { %p788_p11 = por %p135_p10, %p54_p3  ;;  %s795_s28 = sand.u32 1, %s689_s14  }
  0x15   : > { %s462_s29 = sshll.u32 %s795_s28, 3  ;;  %s463_s30 = sshll.u32 %s697_s16, 7 }
  0x16   : > { %s966_s27 = scalar_select %p788_p11, 1, 0 }
  0x17   : > { %s802_s6 = scalar_lea.hbm %s957_s0, %s463_s30  ;;  %s162_s7 = scalar_lea.vmem [#allocation2], %s462_s29 }
  0x18   : > { %s169_s8 = sshll.u32 %s162_s7, 4  ;;  %p808_p0 = pnand %p500_p13, %p771_p4  ;;  %s804_s8 = int_to_ptr.vmem [resolvable:$true] %s169_s8 }
  0x19   : > { %s159_s10 = scalar_lea.sflag [#allocation3], %s795_s28  ;;  %s555_s11 = scalar_lea.hbm %s802_s6, 128 }
  0x1a   : > { %p556_p3 = scmp.ne.s32.totalorder %s802_s6, %s555_s11  ;;  %p557_p5 = pneg %p808_p0 }
  0x1b   : > { %s560_s21 = scalar_lea.hbm %s957_s0, 256  ;;  %p561_p4 = scmp.lt.u32.totalorder %s802_s6, %s957_s0 }
  0x1c   : > { %p558_p6 = pnand %p557_p5, %p556_p3  ;;  %p562_p10 = scmp.lt.u32.totalorder %s560_s21, %s555_s11 }
  0x1d   : > { %p564_p12 = scmp.lt.u32.totalorder %s555_s11, %s802_s6 }
  0x1e   : > { %p559_p7 = pneg %p558_p6  ;;  %p563_p13 = por %p562_p10, %p561_p4 }
  0x20   : > { %p565_p1 = por %p564_p12, %p563_p13 }
  0x22   : > { %p566_p2 = pnand %p565_p1, %p559_p7 }
  0x24   : > { %569 = shalt.err (!%p566_p2)
}
  0x25   : > { %s570_s29 = scalar_lea.vmem %s804_s8, 128  ;;  %s703_s30 = smov [#allocation2]  }
  0x26   : > { %p571_p3 = scmp.ne.s32.totalorder %s804_s8, %s570_s29  ;;  %s575_s4 = sshll.u32 %s703_s30, 4  ;;  %s576_s4 = int_to_ptr.vmem [resolvable:$false] %s575_s4 }
  0x27   : > { %s577_s5 = scalar_lea.vmem %s576_s4, 256  ;;  %p578_p9 = scmp.lt.s32.totalorder %s804_s8, %s576_s4 }
  0x28   : > { %p573_p6 = pnand %p571_p3, %p557_p5  ;;  %p579_p4 = scmp.lt.s32.totalorder %s577_s5, %s570_s29 }
  0x2a   : > { %p574_p11 = pneg %p573_p6  ;;  %p580_p10 = por %p579_p4, %p578_p9 }
  0x2c   : > { %p581_p12 = pnand %p580_p10, %p574_p11 }
  0x2e   : > { %584 = shalt.err (!%p581_p12)
}
  0x2f   : > { %492 = dma.hbm_to_vmem [thread:$0]  (!%p808_p0), %s802_s6, 128, %s804_s8, %s159_s10  }
  0x30   : > { %p968_p1 = scmp.lt.s32.totalorder %s701_s17, 3  ;;  %p969_p2 = scmp.ge.s32.totalorder %s701_s17, 1 }
  0x31   : > { %s464_s11 = sshll.u32 %s795_s28, 5  ;;  %s477_s18 = sshll.u32 %s697_s16, 9 }
  0x32   : > { %p844_p7 = pnand %p969_p2, %p968_p1  ;;  %s853_s22 = scalar_lea.hbm %s958_s1, %s477_s18 }
  0x33   : > { %s180_s23 = scalar_lea.vmem [#allocation5], %s464_s11  ;;  %s177_s6 = scalar_lea.sflag [#allocation6], %s795_s28 }
  0x34   : > { %s189_s29 = sshll.u32 %s180_s23, 4  ;;  %s585_s8 = scalar_lea.hbm %s853_s22, 512  ;;  %s855_s29 = int_to_ptr.vmem [resolvable:$true] %s189_s29 }
  0x35   : > { %p586_p9 = scmp.ne.s32.totalorder %s853_s22, %s585_s8  ;;  %s590_s4 = scalar_lea.hbm %s958_s1, 1024 }
  0x36   : > { %p591_p3 = scmp.lt.u32.totalorder %s853_s22, %s958_s1  ;;  %p592_p6 = scmp.lt.u32.totalorder %s590_s4, %s585_s8 }
  0x37   : > { %p588_p11 = pnand %p586_p9, %p557_p5  ;;  %p594_p10 = scmp.lt.u32.totalorder %s585_s8, %s853_s22 }
  0x38   : > { %p593_p4 = por %p592_p6, %p591_p3 }
  0x39   : > { %p589_p13 = pneg %p588_p11 }
  0x3a   : > { %p595_p12 = por %p594_p10, %p593_p4 }
  0x3c   : > { %p596_p1 = pnand %p595_p12, %p589_p13 }
  0x3e   : > { %599 = shalt.err (!%p596_p1)
}
  0x3f   : > { %s600_s11 = scalar_lea.vmem %s855_s29, 512  ;;  %s704_s19 = smov [#allocation5]  }
  0x40   : > { %p601_p2 = scmp.ne.s32.totalorder %s855_s29, %s600_s11  ;;  %s605_s21 = sshll.u32 %s704_s19, 4  ;;  %s606_s21 = int_to_ptr.vmem [resolvable:$false] %s605_s21 }
  0x41   : > { %s607_s23 = scalar_lea.vmem %s606_s21, 1024  ;;  %p608_p8 = scmp.lt.s32.totalorder %s855_s29, %s606_s21 }
  0x42   : > { %p603_p9 = pnand %p601_p2, %p557_p5  ;;  %p609_p3 = scmp.lt.s32.totalorder %s607_s23, %s600_s11 }
  0x44   : > { %p604_p11 = pneg %p603_p9  ;;  %p610_p6 = por %p609_p3, %p608_p8 }
  0x46   : > { %p611_p4 = pnand %p610_p6, %p604_p11 }
  0x48   : > { %614 = shalt.err (!%p611_p4)
}
  0x49   : > { %s705_s8 = smov 256   ;;  %s706_s10 = smov 16  }
  0x4a   : > { %495 = dma.hbm_to_vmem [thread:$0]  (!%p808_p0), %s853_s22, 512, %s855_s29, %s177_s6, %s705_s8, %s705_s8, %s706_s10  }
  0x4b   : > { %201 = sbr.rel (%p844_p7) target bundleno = 322 (0x142), region = 32  ;;  %s886_s30 = sand.u32 (!%p844_p7), 1, %s685_s13  }
  0x4c   : > { %s468_s4 = sshll.u32 (!%p844_p7), %s886_s30, 3  ;;  %s204_s5 = scalar_lea.sflag (!%p844_p7), [#allocation3], %s886_s30 }
  0x4d   : > { %s207_s18 = scalar_lea.vmem (!%p844_p7), [#allocation2], %s468_s4  ;;  %p971_p8 = scmp.ne.s32.totalorder (!%p844_p7), %s964_s24, 0 }
  0x52   : > { %668 = dma.done.wait (%p971_p8), %s204_s5, 128  }
  0x53   : > { %670 = vsyncadd (%p971_p8), %s204_s5, 4294967168  ;;  %s469_s28 = sshll.u32 %s886_s30, 5  ;;  %s213_s9 = scalar_lea.sflag [#allocation6], %s886_s30 }
  0x54   : > { %s216_s7 = scalar_lea.vmem [#allocation5], %s469_s28 }
  0x55   : > { %672 = dma.done.wait (%p971_p8), %s213_s9, 512  }
  0x56   : > { %674 = vsyncadd (%p971_p8), %s213_s9, 4294966784  ;;  %v707_v0 = vmov 0.0   ;;  %v708_v1 = vmov 0   ;;  %v247_v2 = vld [vmem:[%s216_s7 + $0x8] sm:$0xff]  ;;  %v249_v3 = vld [vmem:[%s216_s7 + $0x18] sm:$0xff]  ;;  %vm257_vm0 = vcmask 130048  }
  0x57   : > { %325 = vmatprep.mubr.f32.mxu0 %v707_v0  ;;  %554 = vset.pattern.permute.xlu0 %v708_v1  ;;  %v246_v4 = vld [vmem:[%s216_s7] sm:$0xff]  ;;  %v479_v5 = vpack.c.bf16 %v249_v3, %v247_v2  ;;  %v248_v6 = vld [vmem:[%s216_s7 + $0x10] sm:$0xff]  ;;  %s470_s24 = sshll.u32 %s886_s30, 4  ;;  %s478_s6 = sshll.u32 %s693_s15, 8 }
  0x58   : > { %v251_v7 = vld [vmem:[%s959_s2] sm:$0xff]  ;;  %v481_v8 = vpack.c.bf16 %v248_v6, %v246_v4  ;;  %s243_s11 = scalar_lea.vmem [#allocation7], %s470_s24  ;;  %s908_s8 = scalar_lea.hbm %s960_s3, %s478_s6 }
  0x59   : > { %254 = vperm.xlu0 %554, %v251_v7   ;;  %480 = vmatprep.subr.bf16.mxu0 %v479_v5  ;;  %v250_v9 = vld [vmem:[%s207_s18] sm:$0xff]  ;;  %s351_s19 = sshll.u32 %s243_s11, 4  ;;  %s335_s10 = scalar_lea.sflag [#allocation4], %s886_s30  ;;  %s910_s19 = int_to_ptr.vmem [resolvable:$true] %s351_s19 }
  0x5a   : > { %482 = vmatpush1.bf16.msra.mxu0 %v481_v8  ;;  %s615_s15 = scalar_lea.vmem %s910_s19, 256  ;;  %p972_p5 = scmp.ne.s32.totalorder %s965_s25, 0 }
  0x5b   : > { %p616_p0 = scmp.ne.s32.totalorder %s910_s19, %s615_s15  ;;  %s709_s4 = smov [#allocation7]  }
  0x5c   : > { %s619_s5 = sshll.u32 %s709_s4, 4  ;;  %s620_s5 = int_to_ptr.vmem [resolvable:$false] %s619_s5 }
  0x5d   : > { %471 = vmatmul.mubr.msk.f32.vlgmr.msra.gmra.mrb[0].mxu0 %vm257_vm0, %v250_v9  ;;  %p617_p7 = pnand %p616_p0, %p972_p5  ;;  %s621_s18 = scalar_lea.vmem %s620_s5, 512 }
  0x5e   : > { %p622_p10 = scmp.lt.s32.totalorder %s910_s19, %s620_s5  ;;  %p623_p12 = scmp.lt.s32.totalorder %s621_s18, %s615_s15 }
  0x5f   : > { %p618_p13 = pneg %p617_p7 }
  0x60   : > { %p624_p1 = por %p623_p12, %p622_p10 }
  0x62   : > { %p625_p2 = pnand %p624_p1, %p618_p13 }
  0xd8   : > { %v255_v10 = vpop.permute.xlu0 %254 }
 0x130   : > { %v327_v11 = vpop.f32.mrb[0].mxu0 }
 0x131   : > { %v328_v12 = vadd.f32 %v327_v11, %v255_v10  ;;  %v329_v13 = vpop.f32.mrb[1].mxu0 }
 0x132   : > { %v330_v14 = vadd.f32 %v329_v13, %v255_v10 }
 0x133   : > { %332 = vst [vmem:[%s243_s11] sm:$0xff] %v328_v12 }
 0x134   : > { %333 = vst [vmem:[%s243_s11 + $0x8] sm:$0xff] %v330_v14 }
 0x135   : > { %628 = shalt.err (!%p625_p2)
}
 0x136   : > { %s629_s30 = scalar_lea.hbm %s908_s8, 256  ;;  %s633_s7 = scalar_lea.hbm %s960_s3, 512 }
 0x137   : > { %p630_p9 = scmp.ne.s32.totalorder %s908_s8, %s629_s30  ;;  %p634_p6 = scmp.lt.u32.totalorder %s908_s8, %s960_s3 }
 0x138   : > { %p635_p4 = scmp.lt.u32.totalorder %s633_s7, %s629_s30  ;;  %p637_p0 = scmp.lt.u32.totalorder %s629_s30, %s908_s8 }
 0x139   : > { %p631_p11 = pnand %p630_p9, %p972_p5 }
 0x13a   : > { %p636_p8 = por %p635_p4, %p634_p6 }
 0x13b   : > { %p632_p3 = pneg %p631_p11 }
 0x13c   : > { %p638_p7 = por %p637_p0, %p636_p8 }
 0x13e   : > { %p639_p13 = pnand %p638_p7, %p632_p3 }
 0x140   : > { %642 = shalt.err (!%p639_p13)
}
 0x141   : > { %487 = dma.vmem_to_hbm [thread:$0]  (%p972_p5), %s910_s19, 256, %s908_s8, %s335_s10  }
 0x142 PF: > { %s363_s24 = sand.u32 1, %s681_s12   ;;  %p973_p10 = scmp.ne.s32.totalorder %s966_s27, 0 }
 0x143   : > { %p974_p12 = scmp.ge.s32.totalorder %s701_s17, 2  ;;  %s364_s6 = scalar_lea.sflag [#allocation4], %s363_s24 }
 0x145   : > { %p497_p1 = pnand %p974_p12, %p973_p10 }
 0x147   : > { %676 = dma.done.wait (!%p497_p1), %s364_s6, 256  }
 0x148   : > { %678 = vsyncadd (!%p497_p1), %s364_s6, 4294967040  ;;  %s22_s17 = sadd.s32 1, %s701_s17   ;;  %s975_s12 = smov %s685_s13 }
 0x149   : > { %p19_p2 = scmp.ge.s32.totalorder %s22_s17, 4   ;;  %s976_s13 = smov %s689_s14 }
 0x14a   : > { %s977_s14 = smov %s786_s26  ;;  %s978_s15 = smov %s697_s16 }
 0x14b   : > { %s979_s16 = smov %s981_s20  ;;  %21 = sbr.rel (!%p19_p2) target bundleno = 8 (0x8), region = 90 }
 0x152   :  { %369 = vsyncpa [#allocation3], 1 }
 0x153   :  { %371 = vsyncpa [#allocation3 + $0x1], 1 }
 0x154   :  { %372 = vsyncpa [#allocation6], 1 }
 0x155   :  { %374 = vsyncpa [#allocation6 + $0x1], 1 }
 0x156   :  { %375 = vsyncpa [#allocation4], 1 }
 0x157   :  { %377 = vsyncpa [#allocation4 + $0x1], 1 }

</bundles_post_ra>
